<compile_context>
chip_gen: v7x
topology: tpu7x:2x2x1
jax: 0.10.0
libtpu: 0.0.40
codegen_flags: <defaults>
</compile_context>

<pallas_src>
import functools

import jax
import jax.numpy as jnp
from jax.experimental import pallas as pl
from jax.experimental.pallas import tpu as pltpu

_LANE = 128      # last-dim tiles must be lane-dense multiples of 128
_SUBLANE = 8     # second-to-last dim multiples of 8


def _round_up(n, m):
    return ((n + m - 1) // m) * m


def _glu_kernel(x_ref, c_ref, wg_ref, bg_ref, wo_ref, bo_ref, o_ref):
    # Gate branch: sigmoid(relu(context) @ Wg + bg).  MXU accumulates in f32,
    # sigmoid/relu stay in f32 on the VPU/EUP (correct on v5e too).
    c = jnp.maximum(c_ref[...], 0.0)
    gate_lin = (
        jnp.dot(c, wg_ref[...], preferred_element_type=jnp.float32) + bg_ref[...]
    )
    gate = jax.nn.sigmoid(gate_lin)

    # Output branch: relu(gate * input) @ Wo + bo.
    h = jnp.maximum(gate * x_ref[...].astype(jnp.float32), 0.0)
    # Precision policy: the second matmul's LHS follows the weight dtype (bf16 weights on
    # v6e/v7x hit the fast MXU path); accumulation stays f32. For f32 weights this is a no-op.
    out = (
        jnp.dot(h.astype(wo_ref.dtype), wo_ref[...],
                preferred_element_type=jnp.float32)
        + bo_ref[...]
    )
    o_ref[...] = out.astype(o_ref.dtype)


@functools.partial(jax.jit, static_argnames=("block_b",))
def glu_forward(x, context, wg, bg, wo, bo, *, block_b=1024):
    """x: (B, input_size), context: (B, gate_size).
    wg: (gate_size, input_size), bg: (input_size,) or (1, input_size)
    wo: (input_size, output_size), bo: (output_size,) or (1, output_size)
    """
    B, d_in = x.shape
    Bc, d_gate = context.shape
    assert Bc == B
    d_out = wo.shape[1]
    assert wg.shape == (d_gate, d_in)
    assert wo.shape[0] == d_in

    bg = bg.reshape(1, d_in)
    bo = bo.reshape(1, d_out)

    # ---- pad feature dims once to the 128-lane width (lane-dense stores, full MXU fill).
    d_in_p = _round_up(d_in, _LANE)
    d_gate_p = _round_up(d_gate, _LANE)
    d_out_p = _round_up(d_out, _LANE)

    # ---- choose the batch tile: as large as requested, clamped to the (sublane-aligned)
    # batch, then pad B so the grid divides evenly.
    blk = min(block_b, _round_up(B, _SUBLANE))
    blk = _round_up(blk, _SUBLANE)
    B_p = _round_up(B, blk)
    grid = (B_p // blk,)

    xp = jnp.pad(x, ((0, B_p - B), (0, d_in_p - d_in)))
    cp = jnp.pad(context, ((0, B_p - B), (0, d_gate_p - d_gate)))
    wgp = jnp.pad(wg, ((0, d_gate_p - d_gate), (0, d_in_p - d_in)))
    bgp = jnp.pad(bg, ((0, 0), (0, d_in_p - d_in)))
    wop = jnp.pad(wo, ((0, d_in_p - d_in), (0, d_out_p - d_out)))
    bop = jnp.pad(bo, ((0, 0), (0, d_out_p - d_out)))

    itemsize = jnp.dtype(x.dtype).itemsize
    w_itemsize = jnp.dtype(wg.dtype).itemsize
    cost = pl.CostEstimate(
        flops=2 * B_p * (d_gate_p * d_in_p + d_in_p * d_out_p),
        transcendentals=B_p * d_in_p,  # sigmoid
        bytes_accessed=(
            (B_p * d_in_p + B_p * d_gate_p + B_p * d_out_p) * itemsize
            + (d_gate_p * d_in_p + d_in_p + d_in_p * d_out_p + d_out_p) * w_itemsize
        ),
    )

    out_p = pl.pallas_call(
        _glu_kernel,
        out_shape=jax.ShapeDtypeStruct((B_p, d_out_p), x.dtype),
        grid_spec=pltpu.PrefetchScalarGridSpec(
            num_scalar_prefetch=0,
            grid=grid,
            in_specs=[
                pl.BlockSpec((blk, d_in_p), lambda i: (i, 0)),      # input tile
                pl.BlockSpec((blk, d_gate_p), lambda i: (i, 0)),    # context tile
                pl.BlockSpec((d_gate_p, d_in_p), lambda i: (0, 0)),  # Wg (grid-invariant)
                pl.BlockSpec((1, d_in_p), lambda i: (0, 0)),         # bg
                pl.BlockSpec((d_in_p, d_out_p), lambda i: (0, 0)),   # Wo (grid-invariant)
                pl.BlockSpec((1, d_out_p), lambda i: (0, 0)),        # bo
            ],
            out_specs=pl.BlockSpec((blk, d_out_p), lambda i: (i, 0)),
        ),
        compiler_params=pltpu.CompilerParams(
            dimension_semantics=("parallel",),
        ),
        cost_estimate=cost,
    )(xp, cp, wgp, bgp, wop, bop)

    # Slice away batch / lane padding.
    return out_p[:B, :d_out]


def _reference(x, context, wg, bg, wo, bo):
    gate = jax.nn.sigmoid(jnp.maximum(context, 0.0) @ wg + bg.reshape(1, -1))
    return jnp.maximum(gate * x, 0.0) @ wo + bo.reshape(1, -1)


if __name__ == "__main__":
    # Small shapes consistent with the module: batch=32, gate_size=32,
    # input_size=64, output_size=48.
    B, gate_size, input_size, output_size = 32, 32, 64, 48

    key = jax.random.PRNGKey(0)
    k_x, k_c, k_wg, k_bg, k_wo, k_bo = jax.random.split(key, 6)

    x = jax.random.normal(k_x, (B, input_size), dtype=jnp.float32)
    context = jax.random.normal(k_c, (B, gate_size), dtype=jnp.float32)

    # Deterministic parameter init (PyTorch-Linear-style uniform bounds).
    bound_g = 1.0 / (gate_size ** 0.5)
    wg = jax.random.uniform(k_wg, (gate_size, input_size), jnp.float32,
                            -bound_g, bound_g)
    bg = jax.random.uniform(k_bg, (1, input_size), jnp.float32, -bound_g, bound_g)

    bound_o = 1.0 / (input_size ** 0.5)
    wo = jax.random.uniform(k_wo, (input_size, output_size), jnp.float32,
                            -bound_o, bound_o)
    bo = jax.random.uniform(k_bo, (1, output_size), jnp.float32, -bound_o, bound_o)

    ref = _reference(x, context, wg, bg, wo, bo)

    # Default large tile: whole (padded) batch in one grid step.
    out = jax.block_until_ready(glu_forward(x, context, wg, bg, wo, bo))
    assert out.shape == (B, output_size)
    assert jnp.allclose(out, ref, atol=1e-5, rtol=1e-5), "mismatch vs reference (single tile)"

    # Small tile to exercise the multi-step grid / output tiling path.
    out_tiled = jax.block_until_ready(
        glu_forward(x, context, wg, bg, wo, bo, block_b=8))
    assert jnp.allclose(out_tiled, ref, atol=1e-5, rtol=1e-5), "mismatch vs reference (tiled)"

    print("KERNEL_OK")
</pallas_src>

<mosaic_0001>
module attributes {stable_mosaic.version = 11 : i64} {
  func.func @_glu_kernel(%arg0: i32, %arg1: memref<32x128xf32, #tpu.memory_space<vmem>>, %arg2: memref<32x128xf32, #tpu.memory_space<vmem>>, %arg3: memref<128x128xf32, #tpu.memory_space<vmem>>, %arg4: memref<1x128xf32, #tpu.memory_space<vmem>>, %arg5: memref<128x128xf32, #tpu.memory_space<vmem>>, %arg6: memref<1x128xf32, #tpu.memory_space<vmem>>, %arg7: memref<32x128xf32, #tpu.memory_space<vmem>>) attributes {dimension_semantics = [#tpu.dimension_semantics<parallel>], iteration_bounds = array<i64: 1>, scalar_prefetch = 0 : i64, scratch_operands = 0 : i64, tpu.core_type = #tpu.core_type<tc>, window_params = [{transform_indices = @transform_0, window_bounds = array<i64: 32, 128>}, {transform_indices = @transform_1, window_bounds = array<i64: 32, 128>}, {pipeline_mode = #tpu.pipeline_mode<synchronous>, transform_indices = @transform_2, window_bounds = array<i64: 128, 128>}, {pipeline_mode = #tpu.pipeline_mode<synchronous>, transform_indices = @transform_3, window_bounds = array<i64: 1, 128>}, {pipeline_mode = #tpu.pipeline_mode<synchronous>, transform_indices = @transform_4, window_bounds = array<i64: 128, 128>}, {pipeline_mode = #tpu.pipeline_mode<synchronous>, transform_indices = @transform_5, window_bounds = array<i64: 1, 128>}, {transform_indices = @transform_6, window_bounds = array<i64: 32, 128>}]} {
    %c0 = arith.constant 0 : index
    %c0_0 = arith.constant 0 : index
    %0 = vector.load %arg2[%c0, %c0_0] : memref<32x128xf32, #tpu.memory_space<vmem>>, vector<32x128xf32>
    %cst = arith.constant 0.000000e+00 : f32
    %1 = vector.broadcast %cst : f32 to vector<32x128xf32>
    %2 = arith.maximumf %0, %1 : vector<32x128xf32>
    %c0_1 = arith.constant 0 : index
    %c0_2 = arith.constant 0 : index
    %3 = vector.load %arg3[%c0_1, %c0_2] : memref<128x128xf32, #tpu.memory_space<vmem>>, vector<128x128xf32>
    %cst_3 = arith.constant dense<0.000000e+00> : vector<32x128xf32>
    %4 = tpu.matmul %2, %3, %cst_3 {dimension_numbers = #tpu.dot_dimension_numbers<[1], [0], [0], [1], [0, 0, 1, 1], [], []>} : vector<32x128xf32>, vector<128x128xf32>, vector<32x128xf32> -> vector<32x128xf32>
    %c0_4 = arith.constant 0 : index
    %c0_5 = arith.constant 0 : index
    %5 = vector.load %arg4[%c0_4, %c0_5] : memref<1x128xf32, #tpu.memory_space<vmem>>, vector<1x128xf32>
    %6 = vector.broadcast %5 : vector<1x128xf32> to vector<32x128xf32>
    %7 = arith.addf %4, %6 : vector<32x128xf32>
    %8 = arith.negf %7 : vector<32x128xf32>
    %9 = math.exp %8 : vector<32x128xf32>
    %cst_6 = arith.constant 1.000000e+00 : f32
    %10 = vector.broadcast %cst_6 : f32 to vector<32x128xf32>
    %11 = arith.addf %10, %9 : vector<32x128xf32>
    %12 = arith.divf %10, %11 : vector<32x128xf32>
    %c0_7 = arith.constant 0 : index
    %c0_8 = arith.constant 0 : index
    %13 = vector.load %arg1[%c0_7, %c0_8] : memref<32x128xf32, #tpu.memory_space<vmem>>, vector<32x128xf32>
    %14 = arith.mulf %12, %13 : vector<32x128xf32>
    %cst_9 = arith.constant 0.000000e+00 : f32
    %15 = vector.broadcast %cst_9 : f32 to vector<32x128xf32>
    %16 = arith.maximumf %14, %15 : vector<32x128xf32>
    %c0_10 = arith.constant 0 : index
    %c0_11 = arith.constant 0 : index
    %17 = vector.load %arg5[%c0_10, %c0_11] : memref<128x128xf32, #tpu.memory_space<vmem>>, vector<128x128xf32>
    %cst_12 = arith.constant dense<0.000000e+00> : vector<32x128xf32>
    %18 = tpu.matmul %16, %17, %cst_12 {dimension_numbers = #tpu.dot_dimension_numbers<[1], [0], [0], [1], [0, 0, 1, 1], [], []>} : vector<32x128xf32>, vector<128x128xf32>, vector<32x128xf32> -> vector<32x128xf32>
    %c0_13 = arith.constant 0 : index
    %c0_14 = arith.constant 0 : index
    %19 = vector.load %arg6[%c0_13, %c0_14] : memref<1x128xf32, #tpu.memory_space<vmem>>, vector<1x128xf32>
    %20 = vector.broadcast %19 : vector<1x128xf32> to vector<32x128xf32>
    %21 = arith.addf %18, %20 : vector<32x128xf32>
    %c0_15 = arith.constant 0 : index
    %c0_16 = arith.constant 0 : index
    %22 = vector.load %arg7[%c0_15, %c0_16] : memref<32x128xf32, #tpu.memory_space<vmem>>, vector<32x128xf32>
    tpu.vector_store %arg7[%c0_15, %c0_16], %21 {strides = array<i32>} : memref<32x128xf32, #tpu.memory_space<vmem>>, vector<32x128xf32>,
    return
  }
  func.func @transform_0(%arg0: i32) -> (i32, i32) {
    %c0_i32 = arith.constant 0 : i32
    %c0_i32_0 = arith.constant 0 : i32
    return %arg0, %c0_i32 : i32, i32
  }
  func.func @transform_1(%arg0: i32) -> (i32, i32) {
    %c0_i32 = arith.constant 0 : i32
    %c0_i32_0 = arith.constant 0 : i32
    return %arg0, %c0_i32 : i32, i32
  }
  func.func @transform_2(%arg0: i32) -> (i32, i32) {
    %c0_i32 = arith.constant 0 : i32
    %c0_i32_0 = arith.constant 0 : i32
    %c0_i32_1 = arith.constant 0 : i32
    return %c0_i32, %c0_i32_0 : i32, i32
  }
  func.func @transform_3(%arg0: i32) -> (i32, i32) {
    %c0_i32 = arith.constant 0 : i32
    %c0_i32_0 = arith.constant 0 : i32
    %c0_i32_1 = arith.constant 0 : i32
    return %c0_i32, %c0_i32_0 : i32, i32
  }
  func.func @transform_4(%arg0: i32) -> (i32, i32) {
    %c0_i32 = arith.constant 0 : i32
    %c0_i32_0 = arith.constant 0 : i32
    %c0_i32_1 = arith.constant 0 : i32
    return %c0_i32, %c0_i32_0 : i32, i32
  }
  func.func @transform_5(%arg0: i32) -> (i32, i32) {
    %c0_i32 = arith.constant 0 : i32
    %c0_i32_0 = arith.constant 0 : i32
    %c0_i32_1 = arith.constant 0 : i32
    return %c0_i32, %c0_i32_0 : i32, i32
  }
  func.func @transform_6(%arg0: i32) -> (i32, i32) {
    %c0_i32 = arith.constant 0 : i32
    %c0_i32_0 = arith.constant 0 : i32
    return %arg0, %c0_i32 : i32, i32
  }
}

</mosaic_0001>

<bundles_post_ra>
// kernel: glu_forward.1
= control target key start
LH: loop header
LB: loop body
LE: loop exit
PB: predicated region body
PF: predicated region fallthrough
CT: control target
= control target key end

     0   :  { %s709_s0 = inlined_call_operand.vmem [shape: f32[32,128], index: 0, kind: input, shape index: {}]   ;;  %s710_s1 = inlined_call_operand.vmem [shape: f32[32,128], index: 1, kind: input, shape index: {}]   ;;  %s711_s2 = inlined_call_operand.vmem [shape: f32[128,128], index: 2, kind: input, shape index: {}]   ;;  %s712_s3 = inlined_call_operand.vmem [shape: f32[1,128], index: 3, kind: input, shape index: {}]   ;;  %s713_s4 = inlined_call_operand.vmem [shape: f32[128,128], index: 4, kind: input, shape index: {}]   ;;  %s714_s5 = inlined_call_operand.vmem [shape: f32[1,128], index: 5, kind: input, shape index: {}]   ;;  %s715_s6 = inlined_call_operand.hbm [shape: f32[32,128], index: 6, kind: output, shape index: {}]  }
   0x1   :  { %v32_v0 = vld [vmem:[%s711_s2] sm:$0xff]  ;;  %v33_v1 = vld [vmem:[%s711_s2 + $0x8] sm:$0xff]  ;;  %v34_v2 = vld [vmem:[%s711_s2 + $0x10] sm:$0xff] }
   0x2   :  { %v426_v3 = vpack.c.bf16 %v33_v1, %v32_v0  ;;  %v35_v4 = vld [vmem:[%s711_s2 + $0x18] sm:$0xff]  ;;  %v36_v6 = vld [vmem:[%s711_s2 + $0x20] sm:$0xff]  ;;  %v37_v7 = vld [vmem:[%s711_s2 + $0x28] sm:$0xff] }
   0x3   :  { %v430_v5 = vpack.c.bf16 %v35_v4, %v34_v2  ;;  %v434_v8 = vpack.c.bf16 %v37_v7, %v36_v6  ;;  %v24_v9 = vld [vmem:[%s710_s1] sm:$0xff]  ;;  %v38_v10 = vld [vmem:[%s711_s2 + $0x30] sm:$0xff]  ;;  %v39_v11 = vld [vmem:[%s711_s2 + $0x38] sm:$0xff] }
   0x4   :  { %427 = vmatprep.subr.bf16.mxu0 %v426_v3  ;;  %v28_v12 = vmax.f32 %v24_v9, 0.0 }
   0x5   :  { %429 = vmatpush3.bf16.msra.mxu0 %v426_v3 }
   0x6   :  { %431 = vmatprep.subr.bf16.mxu0 %v430_v5 }
   0x7   :  { %11 = vsyncpa [#allocation3], 0  ;;  %382 = vmatprep.mubr.f32.mxu0 %v28_v12  ;;  %v438_v13 = vpack.c.bf16 %v39_v11, %v38_v10  ;;  %v40_v14 = vld [vmem:[%s711_s2 + $0x40] sm:$0xff]  ;;  %v41_v15 = vld [vmem:[%s711_s2 + $0x48] sm:$0xff] }
   0x8   :  { %v442_v16 = vpack.c.bf16 %v41_v15, %v40_v14  ;;  %v42_v17 = vld [vmem:[%s711_s2 + $0x50] sm:$0xff]  ;;  %v43_v18 = vld [vmem:[%s711_s2 + $0x58] sm:$0xff]  ;;  %v44_v20 = vld [vmem:[%s711_s2 + $0x60] sm:$0xff] }
   0x9   :  { %433 = vmatpush3.bf16.msra.mxu0 %v430_v5  ;;  %v446_v19 = vpack.c.bf16 %v43_v18, %v42_v17  ;;  %v45_v21 = vld [vmem:[%s711_s2 + $0x68] sm:$0xff]  ;;  %v46_v23 = vld [vmem:[%s711_s2 + $0x70] sm:$0xff]  ;;  %v47_v24 = vld [vmem:[%s711_s2 + $0x78] sm:$0xff] }
   0xa   :  { %435 = vmatprep.subr.bf16.mxu0 %v434_v8  ;;  %v450_v22 = vpack.c.bf16 %v45_v21, %v44_v20  ;;  %v454_v25 = vpack.c.bf16 %v47_v24, %v46_v23  ;;  %v25_v26 = vld [vmem:[%s710_s1 + $0x8] sm:$0xff]  ;;  %v26_v27 = vld [vmem:[%s710_s1 + $0x10] sm:$0xff]  ;;  %v27_v30 = vld [vmem:[%s710_s1 + $0x18] sm:$0xff] }
   0xb   :  { %v29_v28 = vmax.f32 %v25_v26, 0.0  ;;  %v30_v29 = vmax.f32 %v26_v27, 0.0  ;;  %v31_v31 = vmax.f32 %v27_v30, 0.0  ;;  %v176_v32 = vld [vmem:[%s713_s4] sm:$0xff]  ;;  %v177_v33 = vld [vmem:[%s713_s4 + $0x8] sm:$0xff]  ;;  %v178_v35 = vld [vmem:[%s713_s4 + $0x10] sm:$0xff] }
   0xc   :  { %v458_v34 = vpack.c.bf16 %v177_v33, %v176_v32  ;;  %v179_v36 = vld [vmem:[%s713_s4 + $0x18] sm:$0xff]  ;;  %v180_v38 = vld [vmem:[%s713_s4 + $0x20] sm:$0xff]  ;;  %v181_v39 = vld [vmem:[%s713_s4 + $0x28] sm:$0xff] }
   0xd   :  { %437 = vmatpush3.bf16.msra.mxu0 %v434_v8  ;;  %v462_v37 = vpack.c.bf16 %v179_v36, %v178_v35  ;;  %v466_v40 = vpack.c.bf16 %v181_v39, %v180_v38  ;;  %v182_v41 = vld [vmem:[%s713_s4 + $0x30] sm:$0xff]  ;;  %v183_v42 = vld [vmem:[%s713_s4 + $0x38] sm:$0xff]  ;;  %v184_v44 = vld [vmem:[%s713_s4 + $0x40] sm:$0xff] }
   0xe   :  { %439 = vmatprep.subr.bf16.mxu0 %v438_v13  ;;  %459 = vmatprep.subr.bf16.mxu1 %v458_v34  ;;  %v470_v43 = vpack.c.bf16 %v183_v42, %v182_v41  ;;  %v185_v45 = vld [vmem:[%s713_s4 + $0x48] sm:$0xff]  ;;  %v186_v47 = vld [vmem:[%s713_s4 + $0x50] sm:$0xff]  ;;  %v187_v48 = vld [vmem:[%s713_s4 + $0x58] sm:$0xff] }
   0xf   :  { %461 = vmatpush3.bf16.msra.mxu1 %v458_v34  ;;  %v474_v46 = vpack.c.bf16 %v185_v45, %v184_v44  ;;  %v478_v49 = vpack.c.bf16 %v187_v48, %v186_v47  ;;  %v188_v50 = vld [vmem:[%s713_s4 + $0x60] sm:$0xff]  ;;  %v189_v51 = vld [vmem:[%s713_s4 + $0x68] sm:$0xff]  ;;  %v190_v52 = vld [vmem:[%s713_s4 + $0x70] sm:$0xff] }
  0x10   :  { %463 = vmatprep.subr.bf16.mxu1 %v462_v37  ;;  %v482_v53 = vpack.c.bf16 %v189_v51, %v188_v50  ;;  %v191_v54 = vld [vmem:[%s713_s4 + $0x78] sm:$0xff]  ;;  %v304_v56 = vld [vmem:[%s712_s3] ss:$0 sm:$0xff]  ;;  %v166_v20 = vld [vmem:[%s709_s0 + $0x10] sm:$0xff] }
  0x11   :  { %441 = vmatpush3.bf16.msra.mxu0 %v438_v13  ;;  %v486_v55 = vpack.c.bf16 %v191_v54, %v190_v52  ;;  %v165_v13 = vld [vmem:[%s709_s0 + $0x8] sm:$0xff]  ;;  %v164_v14 = vld [vmem:[%s709_s0] sm:$0xff] }
  0x12   :  { %443 = vmatprep.subr.bf16.mxu0 %v442_v16 }
  0x13   :  { %465 = vmatpush3.bf16.msra.mxu1 %v462_v37 }
  0x14   :  { %467 = vmatprep.subr.bf16.mxu1 %v466_v40 }
  0x15   :  { %445 = vmatpush3.bf16.msra.mxu0 %v442_v16 }
  0x16   :  { %447 = vmatprep.subr.bf16.mxu0 %v446_v19 }
  0x17   :  { %469 = vmatpush3.bf16.msra.mxu1 %v466_v40 }
  0x18   :  { %471 = vmatprep.subr.bf16.mxu1 %v470_v43 }
  0x19   :  { %449 = vmatpush3.bf16.msra.mxu0 %v446_v19  ;;  %v167_v19 = vld [vmem:[%s709_s0 + $0x18] sm:$0xff]  ;;  %s533_s0 = smov [#allocation2]  }
  0x1a   :  { %451 = vmatprep.subr.bf16.mxu0 %v450_v22  ;;  %s293_s27 = sshll.u32 %s533_s0, 4  ;;  %s294_s27 = int_to_ptr.vmem [resolvable:$true] %s293_s27 }
  0x1b   :  { %473 = vmatpush3.bf16.msra.mxu1 %v470_v43  ;;  %s509_s28 = scalar_lea.vmem %s294_s27, 512  ;;  %p514_p1 = scmp.lt.s32.totalorder %s294_s27, %s294_s27 }
  0x1c   :  { %475 = vmatprep.subr.bf16.mxu1 %v474_v46  ;;  %p510_p0 = scmp.ne.s32.totalorder %s294_s27, %s509_s28  ;;  %p515_p2 = scmp.lt.s32.totalorder %s509_s28, %s509_s28 }
  0x1d   :  { %453 = vmatpush3.bf16.msra.mxu0 %v450_v22 }
  0x1e   :  { %455 = vmatprep.subr.bf16.mxu0 %v454_v25  ;;  %p516_p3 = por %p515_p2, %p514_p1 }
  0x1f   :  { %477 = vmatpush3.bf16.msra.mxu1 %v474_v46 }
  0x20   :  { %479 = vmatprep.subr.bf16.mxu1 %v478_v49  ;;  %p517_p4 = pnand %p516_p3, %p510_p0 }
  0x21   :  { %457 = vmatpush3.bf16.msra.mxu0 %v454_v25 }
  0x23   :  { %481 = vmatpush3.bf16.msra.mxu1 %v478_v49 }
  0x24   :  { %383 = vmatmul.mubr.f32.vlgmr.msra.gmra.mrb[0].mxu0 %v29_v28  ;;  %483 = vmatprep.subr.bf16.mxu1 %v482_v53 }
  0x25   :  { %385 = vmatprep.mubr.f32.mxu0 %v30_v29  ;;  %v309_v29 = vld [vmem:[%s714_s5] ss:$0 sm:$0xff] }
  0x27   :  { %485 = vmatpush3.bf16.msra.mxu1 %v482_v53 }
  0x28   :  { %386 = vmatmul.mubr.f32.gmra.mrb[2].mxu0 %v31_v31  ;;  %487 = vmatprep.subr.bf16.mxu1 %v486_v55 }
  0x2b   :  { %489 = vmatpush3.bf16.msra.mxu1 %v486_v55 }
  0xf7   :  { %v384_v57 = vpop.f32.mrb[0].mxu0 }
  0xf8   :  { %v127_v58 = vadd.f32 %v384_v57, %v304_v56  ;;  %v121_v59 = vpop.f32.mrb[1].mxu0 }
  0xf9   :  { %v122_v60 = vadd.f32 %v304_v56, %v121_v59 }
  0xfa   :  { %v306_v61 = vmul.f32 -1.442695, %v127_v58 }
  0xfb   :  { %v305_v62 = vmul.f32 -1.442695, %v122_v60  ;;  %v387_v63 = vpop.f32.mrb[2].mxu0 }
  0xfc   :  { %493 = vpow2.f32 %v306_v61  ;;  %v137_v0 = vadd.f32 %v387_v63, %v304_v56  ;;  %v131_v1 = vpop.f32.mrb[3].mxu0 }
  0xfd   :  { %495 = vpow2.f32 %v305_v62  ;;  %v132_v2 = vadd.f32 %v304_v56, %v131_v1 }
  0xfe   :  { %v308_v3 = vmul.f32 -1.442695, %v137_v0 }
  0xff   :  { %v307_v4 = vmul.f32 -1.442695, %v132_v2 }
 0x100   :  { %497 = vpow2.f32 %v308_v3 }
 0x101   :  { %499 = vpow2.f32 %v307_v4 }
 0x106   :  { %v494_v5 = vpop.eup %493 }
 0x107   :  { %v496_v6 = vpop.eup %495  ;;  %v153_v7 = vadd.f32 1.0, %v494_v5 }
 0x108   :  { %v152_v8 = vadd.f32 1.0, %v496_v6 }
 0x109   :  { %501 = vrcp.f32 %v153_v7 }
 0x10a   :  { %v498_v9 = vpop.eup %497  ;;  %503 = vrcp.f32 %v152_v8 }
 0x10b   :  { %v500_v10 = vpop.eup %499  ;;  %v155_v11 = vadd.f32 1.0, %v498_v9 }
 0x10c   :  { %v154_v12 = vadd.f32 1.0, %v500_v10 }
 0x10d   :  { %505 = vrcp.f32 %v155_v11 }
 0x10e   :  { %507 = vrcp.f32 %v154_v12 }
 0x113   :  { %v502_v15 = vpop.eup %501 }
 0x114   :  { %v504_v16 = vpop.eup %503  ;;  %v169_v17 = vmul.f32 %v502_v15, %v165_v13 }
 0x115   :  { %v168_v18 = vmul.f32 %v504_v16, %v164_v14 }
 0x116   :  { %v173_v24 = vmax.f32 %v169_v17, 0.0 }
 0x117   :  { %v506_v21 = vpop.eup %505  ;;  %v172_v22 = vmax.f32 %v168_v18, 0.0 }
 0x118   :  { %v508_v23 = vpop.eup %507  ;;  %v171_v25 = vmul.f32 %v506_v21, %v167_v19 }
 0x119   :  { %420 = vmatprep.mubr.f32.mxu1 %v172_v22  ;;  %v170_v26 = vmul.f32 %v508_v23, %v166_v20 }
 0x11a   :  { %421 = vmatmul.mubr.f32.vlgmr.msra.gmra.mrb[0].mxu1 %v173_v24  ;;  %v175_v28 = vmax.f32 %v171_v25, 0.0 }
 0x11b   :  { %v174_v27 = vmax.f32 %v170_v26, 0.0 }
 0x11d   :  { %423 = vmatprep.mubr.f32.mxu1 %v174_v27 }
 0x11e   :  { %424 = vmatmul.mubr.f32.gmra.mrb[2].mxu1 %v175_v28 }
 0x1ed   :  { %v422_v30 = vpop.f32.mrb[0].mxu1 }
 0x1ee   :  { %v271_v31 = vadd.f32 %v422_v30, %v309_v29  ;;  %v265_v32 = vpop.f32.mrb[1].mxu1 }
 0x1ef   :  { %v266_v33 = vadd.f32 %v309_v29, %v265_v32 }
 0x1f0   :  { %285 = vst [vmem:[#allocation2 + $0x8] sm:$0xff] %v271_v31 }
 0x1f1   :  { %284 = vst [vmem:[#allocation2] sm:$0xff] %v266_v33  ;;  %v425_v34 = vpop.f32.mrb[2].mxu1 }
 0x1f2   :  { %v281_v35 = vadd.f32 %v425_v34, %v309_v29  ;;  %v275_v36 = vpop.f32.mrb[3].mxu1 }
 0x1f3   :  { %v276_v37 = vadd.f32 %v309_v29, %v275_v36 }
 0x1f4   :  { %287 = vst [vmem:[#allocation2 + $0x18] sm:$0xff] %v281_v35 }
 0x1f5   :  { %286 = vst [vmem:[#allocation2 + $0x10] sm:$0xff] %v276_v37 }
 0x1f6   :  { %520 = shalt.err (!%p517_p4)
}
 0x1f7   :  { %s521_s30 = scalar_lea.hbm %s715_s6, 512 }
 0x1f8   :  { %p522_p5 = scmp.ne.s32.totalorder %s715_s6, %s521_s30  ;;  %p525_p6 = scmp.lt.u32.totalorder %s521_s30, %s715_s6 }
 0x1fa   :  { %p527_p7 = pnand %p525_p6, %p522_p5 }
 0x1fc   :  { %530 = shalt.err (!%p527_p7)
}
 0x1fd   :  { %s534_s11 = smov 128   ;;  %s535_s12 = smov 8  }
 0x1fe   :  { %299 = dma.vmem_to_hbm [thread:$0]  %s294_s27, 512, %s715_s6, [#allocation3], %s534_s11, %s534_s11, %s535_s12  }
 0x1ff   :  { %531 = dma.done.wait [#allocation3], 512  }
 0x200   :  { %532 = vsyncadd [#allocation3], 4294966784 }
 0x201   :  { %303 = vsyncpa [#allocation3], 1 }

</bundles_post_ra>
